<compile_context>
chip_gen: v5e
topology: v5e:2x2
jax: 0.10.0
libtpu: 0.0.40
codegen_flags: <defaults>
</compile_context>

<pallas_src>
import jax
import jax.numpy as jnp
from jax.experimental import pallas as pl
from jax.experimental.pallas import tpu as pltpu

_TEMP = 0.01
# Padded (lane-axis) similarities saturate the sigmoid to exactly 0
# (tanh(-5e31) == -1), so padded columns drop out of every row sum; padded rows
# are killed by pos == 0.  Keep this FINITE: -inf would produce
# (-inf) - (-inf) = NaN on pad/pad entries and poison the row sums.
_PAD_SIM = -1e30


def _smooth_ap_kernel(d_lane_ref, pos_lane_ref, dpos_sub_ref, out_ref):
    # d_lane/pos_lane: (1, 1, NC)  -- d[k], pos[k] for this query (grid-invariant
    #                                 over the row-block axis).
    # dpos_sub:        (1, TM, 2)  -- packed [d[j], pos[j]] for this row block.
    d_row = d_lane_ref[0]          # (1, NC)
    pos_row = pos_lane_ref[0]      # (1, NC)
    dp = dpos_sub_ref[0]           # (TM, 2)
    d_col = dp[:, 0:1]             # (TM, 1)   d[j]
    pos_col = dp[:, 1:2]           # (TM, 1)   pos[j]

    # sigmoid((d[k]-d[j])/temp) = 0.5*(1 + tanh((d[k]-d[j])/(2*temp)))
    z = (d_row - d_col) * (0.5 / _TEMP)            # (TM, NC)
    s = 0.5 + 0.5 * jnp.tanh(z)                    # exactly 0.5 on the diagonal

    # Row reductions; correct the diagonal analytically (S[j,j] == 0.5 exactly)
    # instead of building an off-diagonal mask.
    sum_s = jnp.sum(s, axis=1, keepdims=True)              # (TM, 1) sum_k S[j,k]
    sum_sp = jnp.sum(s * pos_row, axis=1, keepdims=True)   # (TM, 1) sum_k S[j,k]*pos[k]

    r = 0.5 + sum_s                       # = 1 + sum_{k != j} S[j,k]
    r_pos = 1.0 + sum_sp - 0.5 * pos_col  # = 1 + sum_{k != j} S[j,k]*pos[k]
    ratio = pos_col * r_pos / r           # padded / negative rows -> 0

    partial = jnp.sum(ratio)
    # Lane-dense (1,1,1,128) store; wrapper reads lane 0.
    out_ref[...] = jnp.zeros(out_ref.shape, out_ref.dtype) + partial


def _round_up(x, m):
    return (x + m - 1) // m * m


def _choose_tm(n, n_col):
    # Row-tile sizing:
    #  * multiple of 8 (f32 sublane granularity) -- no 128 floor, so at N=16
    #    only 16 rows of tanh are computed, not 128;
    #  * close to the real N so padded-row work is not thrown away;
    #  * capped at 256 and by a ~2 MiB budget for the (TM, n_col) f32 score
    #    slab (fits every generation's default scoped VMEM together with the
    #    elementwise temporaries and double-buffered row operands);
    #  * floor of 8 (vmem_limit_bytes is set explicitly for very large n_col).
    budget_rows = ((2 << 20) // (4 * n_col)) // 8 * 8
    return max(8, min(256, _round_up(n, 8), max(8, budget_rows)))


def smooth_ap_batched(d, pos):
    """d: (B, N) similarities; pos: (B, N) positive mask. Returns (B,) float32."""
    d = d.astype(jnp.float32)
    pos = pos.astype(jnp.float32)
    b, n = d.shape

    n_col = _round_up(max(n, 1), 128)      # lane (k) axis, padded to 128
    tm = _choose_tm(max(n, 1), n_col)      # row (j) tile, multiple of 8
    n_row = _round_up(max(n, 1), tm)       # row (j) axis, padded to tm
    nb = n_row // tm

    # Lane layout (k along lanes), grid-invariant per query.
    d_lane = jnp.pad(d, ((0, 0), (0, n_col - n)), constant_values=_PAD_SIM)
    pos_lane = jnp.pad(pos, ((0, 0), (0, n_col - n)))
    d_lane = d_lane.reshape(b, 1, n_col)
    pos_lane = pos_lane.reshape(b, 1, n_col)

    # Sublane layout (j along sublanes), packed [d, pos]: one (tm, 2) block
    # per step replaces two (tm, 1) DMAs.
    d_sub = jnp.pad(d, ((0, 0), (0, n_row - n)), constant_values=_PAD_SIM)
    pos_sub = jnp.pad(pos, ((0, 0), (0, n_row - n)))
    dpos_sub = jnp.stack([d_sub, pos_sub], axis=-1)        # (B, n_row, 2)

    partials = pl.pallas_call(
        _smooth_ap_kernel,
        out_shape=jax.ShapeDtypeStruct((b, nb, 1, 128), jnp.float32),
        grid=(b, nb),
        in_specs=[
            pl.BlockSpec((1, 1, n_col), lambda bi, i: (bi, 0, 0)),   # d_lane   (resident per query)
            pl.BlockSpec((1, 1, n_col), lambda bi, i: (bi, 0, 0)),   # pos_lane (resident per query)
            pl.BlockSpec((1, tm, 2), lambda bi, i: (bi, i, 0)),      # packed [d[j], pos[j]] row tile
        ],
        out_specs=pl.BlockSpec((1, 1, 1, 128), lambda bi, i: (bi, i, 0, 0)),
        compiler_params=pltpu.CompilerParams(
            dimension_semantics=("parallel", "parallel"),
            vmem_limit_bytes=32 << 20),
    )(d_lane, pos_lane, dpos_sub)

    totals = jnp.sum(partials[:, :, 0, 0], axis=1)          # (B,)
    num_pos = jnp.sum(pos, axis=1)                          # (B,)
    return jnp.where(num_pos == 0.0,
                     jnp.float32(0.0001),
                     totals / jnp.maximum(num_pos, 1.0))


def smooth_ap(sim_all, pos_mask_):
    """Module-equivalent forward. sim_all: (N,1) float; pos_mask_: (1,N+1) bool.

    Returns a (1,) float32 array (matches the PyTorch module's shape-(1,) output).
    """
    n = sim_all.shape[0]
    d = jnp.reshape(sim_all, (1, n))
    pos = pos_mask_[:, 1:].astype(jnp.float32)              # (1, N)
    return smooth_ap_batched(d, pos)


def smooth_ap_reference(sim_all, pos_mask_):
    """Pure-JAX reference of the PyTorch forward (for correctness check)."""
    d = jnp.reshape(sim_all, (-1,)).astype(jnp.float32)
    pos = pos_mask_[:, 1:].astype(jnp.float32)[0]
    n = d.shape[0]
    D = d[None, :] - d[:, None]
    S = 1.0 / (1.0 + jnp.exp(jnp.clip(-D / 0.01, -50.0, 50.0)))
    D_ = S * (1.0 - jnp.eye(n, dtype=jnp.float32))
    D_pos = D_ * pos[None, :]
    R = 1.0 + jnp.sum(D_, axis=1)
    R_pos = (1.0 + jnp.sum(D_pos, axis=1)) * pos
    P = jnp.sum(pos)
    return jnp.where(P == 0.0, 0.0001, jnp.sum(R_pos / R) / P)


if __name__ == "__main__":
    key = jax.random.PRNGKey(0)
    k_sim, k_pos, k_bsim, k_bpos = jax.random.split(key, 4)

    # --- single query, module-shaped inputs (as in the PyTorch forward) ---
    N = 16                                     # retrieval-set size
    sim_all = jax.random.normal(k_sim, (N, 1), dtype=jnp.float32)
    # pos_mask_ has an extra leading column (dropped via [:, 1:] in forward)
    pos_mask_ = jax.random.bernoulli(k_pos, p=0.4, shape=(1, N + 1))
    pos_mask_ = pos_mask_.at[0, 1].set(True)   # at least one positive

    out = jax.block_until_ready(smooth_ap(sim_all, pos_mask_))
    ref = jax.block_until_ready(smooth_ap_reference(sim_all, pos_mask_))
    assert out.shape == (1,)
    assert jnp.allclose(out[0], ref, rtol=1e-5, atol=1e-5), (out, ref)

    # --- batched path: B queries through ONE pallas_call (review's main ask) ---
    B = 8
    d_b = jax.random.normal(k_bsim, (B, N), dtype=jnp.float32)
    pos_b = jax.random.bernoulli(k_bpos, p=0.4, shape=(B, N))
    pos_b = pos_b.at[:, 0].set(True)           # at least one positive per query

    out_b = jax.block_until_ready(smooth_ap_batched(d_b, pos_b))
    refs_b = jnp.stack([
        smooth_ap_reference(
            d_b[i].reshape(N, 1),
            jnp.concatenate([jnp.zeros((1, 1), dtype=bool), pos_b[i:i + 1]], axis=1))
        for i in range(B)
    ])
    assert out_b.shape == (B,)
    assert jnp.allclose(out_b, refs_b, rtol=1e-5, atol=1e-5), (out_b, refs_b)

    print("KERNEL_OK")
</pallas_src>

<mosaic_0001>
module attributes {stable_mosaic.version = 11 : i64} {
  func.func @_smooth_ap_kernel(%arg0: i32, %arg1: i32, %arg2: memref<1x1x128xf32, #tpu.memory_space<vmem>>, %arg3: memref<1x1x128xf32, #tpu.memory_space<vmem>>, %arg4: memref<1x16x2xf32, #tpu.memory_space<vmem>>, %arg5: memref<1x1x1x128xf32, #tpu.memory_space<vmem>>) attributes {dimension_semantics = [#tpu.dimension_semantics<parallel>, #tpu.dimension_semantics<parallel>], iteration_bounds = array<i64: 1, 1>, scalar_prefetch = 0 : i64, scratch_operands = 0 : i64, tpu.core_type = #tpu.core_type<tc>, window_params = [{transform_indices = @transform_0, window_bounds = array<i64: 1, 1, 128>}, {transform_indices = @transform_1, window_bounds = array<i64: 1, 1, 128>}, {transform_indices = @transform_2, window_bounds = array<i64: 1, 16, 2>}, {transform_indices = @transform_3, window_bounds = array<i64: 1, 1, 1, 128>}]} {
    %c0 = arith.constant 0 : index
    %c0_0 = arith.constant 0 : index
    %c0_1 = arith.constant 0 : index
    %0 = vector.load %arg2[%c0, %c0_0, %c0_1] : memref<1x1x128xf32, #tpu.memory_space<vmem>>, vector<1x1x128xf32>
    %1 = vector.shape_cast %0 : vector<1x1x128xf32> to vector<1x128xf32>
    %c0_2 = arith.constant 0 : index
    %c0_3 = arith.constant 0 : index
    %c0_4 = arith.constant 0 : index
    %2 = vector.load %arg3[%c0_2, %c0_3, %c0_4] : memref<1x1x128xf32, #tpu.memory_space<vmem>>, vector<1x1x128xf32>
    %3 = vector.shape_cast %2 : vector<1x1x128xf32> to vector<1x128xf32>
    %c0_5 = arith.constant 0 : index
    %c0_6 = arith.constant 0 : index
    %c0_7 = arith.constant 0 : index
    %4 = vector.load %arg4[%c0_5, %c0_6, %c0_7] : memref<1x16x2xf32, #tpu.memory_space<vmem>>, vector<1x16x2xf32>
    %5 = vector.shape_cast %4 : vector<1x16x2xf32> to vector<16x2xf32>
    %6 = vector.extract_strided_slice %5 {offsets = [0, 0], sizes = [16, 1], strides = [1, 1]} : vector<16x2xf32> to vector<16x1xf32>
    %7 = vector.extract_strided_slice %5 {offsets = [0, 1], sizes = [16, 1], strides = [1, 1]} : vector<16x2xf32> to vector<16x1xf32>
    %8 = vector.broadcast %1 : vector<1x128xf32> to vector<16x128xf32>
    %9 = vector.broadcast %6 : vector<16x1xf32> to vector<16x128xf32>
    %10 = arith.subf %8, %9 : vector<16x128xf32>
    %cst = arith.constant 5.000000e+01 : f32
    %11 = vector.broadcast %cst : f32 to vector<16x128xf32>
    %12 = arith.mulf %10, %11 : vector<16x128xf32>
    %13 = math.tanh %12 : vector<16x128xf32>
    %cst_8 = arith.constant 5.000000e-01 : f32
    %14 = vector.broadcast %cst_8 : f32 to vector<16x128xf32>
    %15 = arith.mulf %14, %13 : vector<16x128xf32>
    %cst_9 = arith.constant 5.000000e-01 : f32
    %16 = vector.broadcast %cst_9 : f32 to vector<16x128xf32>
    %17 = arith.addf %16, %15 : vector<16x128xf32>
    %cst_10 = arith.constant dense<0.000000e+00> : vector<16xf32>
    %18 = vector.multi_reduction <add>, %17, %cst_10 [1] : vector<16x128xf32> to vector<16xf32>
    %19 = vector.shape_cast %18 : vector<16xf32> to vector<16x1xf32>
    %20 = vector.broadcast %3 : vector<1x128xf32> to vector<16x128xf32>
    %21 = arith.mulf %17, %20 : vector<16x128xf32>
    %cst_11 = arith.constant dense<0.000000e+00> : vector<16xf32>
    %22 = vector.multi_reduction <add>, %21, %cst_11 [1] : vector<16x128xf32> to vector<16xf32>
    %23 = vector.shape_cast %22 : vector<16xf32> to vector<16x1xf32>
    %cst_12 = arith.constant 5.000000e-01 : f32
    %24 = vector.broadcast %cst_12 : f32 to vector<16x1xf32>
    %25 = arith.addf %24, %19 : vector<16x1xf32>
    %cst_13 = arith.constant 1.000000e+00 : f32
    %26 = vector.broadcast %cst_13 : f32 to vector<16x1xf32>
    %27 = arith.addf %26, %23 : vector<16x1xf32>
    %cst_14 = arith.constant 5.000000e-01 : f32
    %28 = vector.broadcast %cst_14 : f32 to vector<16x1xf32>
    %29 = arith.mulf %28, %7 : vector<16x1xf32>
    %30 = arith.subf %27, %29 : vector<16x1xf32>
    %31 = arith.mulf %7, %30 : vector<16x1xf32>
    %32 = arith.divf %31, %25 : vector<16x1xf32>
    %33 = vector.shape_cast %32 : vector<16x1xf32> to vector<1x16x1xf32>
    %cst_15 = arith.constant dense<0.000000e+00> : vector<1xf32>
    %34 = vector.multi_reduction <add>, %33, %cst_15 [1, 2] : vector<1x16x1xf32> to vector<1xf32>
    %35 = vector.shape_cast %34 : vector<1xf32> to vector<1x1x1xf32>
    %36 = vector.extract %35[0, 0, 0] : f32 from vector<1x1x1xf32>
    %cst_16 = arith.constant 0.000000e+00 : f32
    %37 = vector.broadcast %cst_16 : f32 to vector<1x1x1x128xf32>
    %38 = vector.broadcast %36 : f32 to vector<1x1x1x128xf32>
    %39 = arith.addf %37, %38 : vector<1x1x1x128xf32>
    %c0_17 = arith.constant 0 : index
    %c0_18 = arith.constant 0 : index
    %c0_19 = arith.constant 0 : index
    %c0_20 = arith.constant 0 : index
    %40 = vector.load %arg5[%c0_17, %c0_18, %c0_19, %c0_20] : memref<1x1x1x128xf32, #tpu.memory_space<vmem>>, vector<1x1x1x128xf32>
    tpu.vector_store %arg5[%c0_17, %c0_18, %c0_19, %c0_20], %39 {strides = array<i32>} : memref<1x1x1x128xf32, #tpu.memory_space<vmem>>, vector<1x1x1x128xf32>,
    return
  }
  func.func @transform_0(%arg0: i32, %arg1: i32) -> (i32, i32, i32) {
    %c0_i32 = arith.constant 0 : i32
    %c0_i32_0 = arith.constant 0 : i32
    %c0_i32_1 = arith.constant 0 : i32
    return %arg0, %c0_i32, %c0_i32_0 : i32, i32, i32
  }
  func.func @transform_1(%arg0: i32, %arg1: i32) -> (i32, i32, i32) {
    %c0_i32 = arith.constant 0 : i32
    %c0_i32_0 = arith.constant 0 : i32
    %c0_i32_1 = arith.constant 0 : i32
    return %arg0, %c0_i32, %c0_i32_0 : i32, i32, i32
  }
  func.func @transform_2(%arg0: i32, %arg1: i32) -> (i32, i32, i32) {
    %c0_i32 = arith.constant 0 : i32
    %c0_i32_0 = arith.constant 0 : i32
    return %arg0, %arg1, %c0_i32 : i32, i32, i32
  }
  func.func @transform_3(%arg0: i32, %arg1: i32) -> (i32, i32, i32, i32) {
    %c0_i32 = arith.constant 0 : i32
    %c0_i32_0 = arith.constant 0 : i32
    %c0_i32_1 = arith.constant 0 : i32
    return %arg0, %arg1, %c0_i32, %c0_i32_0 : i32, i32, i32, i32
  }
}

</mosaic_0001>

<bundles_post_ra>
// kernel: tpu_custom_call.1
= control target key start
LH: loop header
LB: loop body
LE: loop exit
PB: predicated region body
PF: predicated region fallthrough
CT: control target
= control target key end

     0   :  { %v177_v1 = vmov 0   ;;  %s220_s0 = inlined_call_operand.vmem [shape: f32[1,1,128], index: 0, kind: input, shape index: {}]   ;;  %s221_s1 = inlined_call_operand.vmem [shape: f32[1,1,128], index: 1, kind: input, shape index: {}]   ;;  %s222_s2 = inlined_call_operand.vmem [shape: f32[1,16,2], index: 2, kind: input, shape index: {}]   ;;  %s223_s3 = inlined_call_operand.hbm [shape: f32[1,1,1,128], index: 3, kind: output, shape index: {}]  }
   0x1   :  { %v17_v0 = vld [vmem:[%s222_s2] sm:$0xff]  ;;  %140 = vset.pattern.permute.xlu0 %v177_v1 }
   0x2   :  { %8 = vsyncpa [#allocation3], 0  ;;  %24 = vperm.xlu0 %140, %v17_v0   ;;  %v206_v2 = vld [vmem:[%s222_s2 + $0x8] sm:$0xff]  ;;  %v141_v3 = vld [vmem:[%s220_s0] ss:$0 sm:$0xff]  ;;  %v59_v25 = vmul.f32 0.5, %v17_v0 }
   0x3   :  { %v142_v12 = vld [vmem:[%s221_s1] ss:$0 sm:$0xff]  ;;  %v60_v36 = vmul.f32 0.5, %v206_v2  ;;  %s178_s0 = smov 127   ;;  %vm103_vm8 = vcmask 7168   ;;  %s179_s1 = smov [#allocation2]  }
   0x4   :  { %s124_s2 = sshll.u32 %s179_s1, 4  ;;  %s126_s22 = sshll.u32 %s223_s3, 4  ;;  %s125_s2 = int_to_ptr.vmem [resolvable:$true] %s124_s2  ;;  %s127_s22 = int_to_ptr.hbm [resolvable:$true] %s126_s22 }
   0xa   :  { %29 = vperm.xlu0 %140, %v206_v2  }
  0x74   :  { %v25_v4 = vpop.permute.xlu0 %24 }
  0x75   :  { %v32_v5 = vsub.f32 %v141_v3, %v25_v4 }
  0x77   :  { %v34_v6 = vmul.f32 50.0, %v32_v5 }
  0x79   :  { %143 = vtanh.f32 %v34_v6 }
  0x7c   :  { %v30_v7 = vpop.permute.xlu0 %29 }
  0x7d   :  { %v33_v8 = vsub.f32 %v141_v3, %v30_v7 }
  0x7f   :  { %v144_v9 = vpop.eup %143  ;;  %v35_v10 = vmul.f32 50.0, %v33_v8 }
  0x80   :  { %v38_v11 = vmul.f32 0.5, %v144_v9 }
  0x81   :  { %145 = vtanh.f32 %v35_v10 }
  0x82   :  { %v40_v13 = vadd.f32 0.5, %v38_v11 }
  0x84   :  { %42 = vadd.xlane.f32.xlu1 %v40_v13  ;;  %v49_v14 = vmul.f32 %v142_v12, %v40_v13 }
  0x86   :  { %51 = vadd.xlane.f32.xlu2 %v49_v14 }
  0x87   :  { %v146_v15 = vpop.eup %145 }
  0x88   :  { %v39_v16 = vmul.f32 0.5, %v146_v15 }
  0x8a   :  { %v41_v17 = vadd.f32 0.5, %v39_v16 }
  0x8c   :  { %44 = vadd.xlane.f32.xlu1 %v41_v17  ;;  %v50_v18 = vmul.f32 %v142_v12, %v41_v17 }
  0x8e   :  { %53 = vadd.xlane.f32.xlu2 %v50_v18 }
  0xf7   :  { %v43_v19 = vpop.xlane.xlu1 %42 }
  0xf8   :  { %v55_v20 = vadd.f32 0.5, %v43_v19 }
  0xf9   :  { %v52_v21 = vpop.xlane.xlu2 %51 }
  0xfa   :  { %147 = vrcp.f32 %v55_v20  ;;  %v57_v27 = vadd.f32 1.0, %v52_v21  ;;  %v74_v29 = vand.u32 2147483647, %v55_v20  ;;  %v76_v30 = vand.u32 2147483648, %v55_v20 }
  0xfb   :  { %vm70_vm1 = vweird.f32 %v55_v20 }
  0xfc   :  { %v61_v31 = vsub.f32 %v57_v27, %v59_v25  ;;  %vm75_vm3 = vcmp.eq.f32.partialorder %v74_v29, 8.507059e+37  ;;  %v77_v37 = vor.u32 1.1754944e-38, %v76_v30 }
  0xfe   :  { %v63_v38 = vmul.f32 %v61_v31, %v17_v0 }
  0xff   :  { %v45_v22 = vpop.xlane.xlu1 %44 }
 0x100   :  { %v148_v23 = vpop.eup %147  ;;  %v56_v24 = vadd.f32 0.5, %v45_v22 }
 0x101   :  { %v66_v26 = vmul.f32 %v148_v23, %v55_v20  ;;  %vm71_vm0 = vweird.f32 %v148_v23  ;;  %v54_v33 = vpop.xlane.xlu2 %53 }
 0x102   :  { %149 = vrcp.f32 %v56_v24  ;;  %vm72_vm2 = vmor %vm70_vm1, %vm71_vm0  ;;  %v58_v40 = vadd.f32 1.0, %v54_v33  ;;  %v91_v45 = vand.u32 2147483648, %v56_v24  ;;  %v89_v48 = vand.u32 2147483647, %v56_v24 }
 0x103   :  { %v67_v28 = vsub.f32 1.0, %v66_v26  ;;  %vm85_vm5 = vweird.f32 %v56_v24 }
 0x104   :  { %v62_v46 = vsub.f32 %v58_v40, %v60_v36  ;;  %v92_v50 = vor.u32 1.1754944e-38, %v91_v45  ;;  %vm90_vm7 = vcmp.eq.f32.partialorder %v89_v48, 8.507059e+37 }
 0x105   :  { %v68_v32 = vmul.f32 %v148_v23, %v67_v28 }
 0x106   :  { %v64_v51 = vmul.f32 %v62_v46, %v206_v2 }
 0x107   :  { %v69_v34 = vadd.f32 %v148_v23, %v68_v32 }
 0x108   :  { %v150_v35 = vpop.eup %149 }
 0x109   :  { %v81_v39 = vmul.f32 %v150_v35, %v56_v24  ;;  %v73_v41 = vsel %vm72_vm2, %v148_v23, %v69_v34  ;;  %vm86_vm4 = vweird.f32 %v150_v35 }
 0x10a   :  { %v78_v42 = vsel %vm75_vm3, %v77_v37, %v73_v41  ;;  %vm87_vm6 = vmor %vm85_vm5, %vm86_vm4 }
 0x10b   :  { %v82_v43 = vsub.f32 1.0, %v81_v39  ;;  %v79_v44 = vmul.f32 %v78_v42, %v63_v38 }
 0x10d   :  { %97 = vrot.lane.b32.xlu0 %v79_v44, %s178_s0  ;;  %v83_v47 = vmul.f32 %v150_v35, %v82_v43 }
 0x10f   :  { %v84_v49 = vadd.f32 %v150_v35, %v83_v47 }
 0x111   :  { %v88_v52 = vsel %vm87_vm6, %v150_v35, %v84_v49 }
 0x112   :  { %v93_v53 = vsel %vm90_vm7, %v92_v50, %v88_v52 }
 0x113   :  { %v94_v54 = vmul.f32 %v93_v53, %v64_v51 }
 0x115   :  { %99 = vrot.lane.b32.xlu1 %v94_v54, %s178_s0 }
 0x17f   :  { %v98_v55 = vpop.permute.xlu0 %97 }
 0x180   :  { %v104_v57 = vsel %vm103_vm8, %v98_v55, 0.0 }
 0x187   :  { %v100_v56 = vpop.permute.xlu1 %99 }
 0x188   :  { %v105_v58 = vsel %vm103_vm8, %v100_v56, 0.0 }
 0x189   :  { %v106_v59 = vadd.f32 %v105_v58, %v104_v57 }
 0x18b   :  { %107 = vadd.xlane.f32.xlu2 %v106_v59 }
 0x1fe   :  { %v108_v60 = vpop.xlane.xlu2 %107 }
 0x1ff   :  { %v109_v61 = vrot.slane %v108_v60, 4 }
 0x201   :  { %v110_v62 = vadd.f32 %v109_v61, %v108_v60 }
 0x203   :  { %v111_v63 = vrot.slane %v110_v62, 2 }
 0x205   :  { %v112_v0 = vadd.f32 %v111_v63, %v110_v62 }
 0x207   :  { %v113_v1 = vrot.slane %v112_v0, 1 }
 0x209   :  { %v114_v3 = vadd.f32 %v113_v1, %v112_v0 }
 0x20b   :  { %135 = vpush %v114_v3 }
 0x23c   :  { %s136_s23 = spop %135 }
 0x23d   :  { %v116_v2 = vstv %s136_s23 }
 0x23e   :  { %118 = vst [vmem:[#allocation2] sm:$0x1] %v116_v2 }
 0x23f   :  { %129 = dma.vmem_to_hbm [thread:$0]  %s125_s2, 16, %s127_s22, [#allocation3]  }
 0x240   :  { %175 = dma.done.wait [#allocation3], 16  }
 0x241   :  { %176 = vsyncadd [#allocation3], 4294967280 }
 0x242   :  { %134 = vsyncpa [#allocation3], 1 }

</bundles_post_ra>
